<compile_context>
chip_gen: v5e
topology: v5e:2x2
jax: 0.10.0
libtpu: 0.0.40
codegen_flags: <defaults>
</compile_context>

<pallas_src>
import functools

import jax
import jax.numpy as jnp
from jax.experimental import pallas as pl
from jax.experimental.pallas import tpu as pltpu


def _round_up(n: int, m: int) -> int:
    return ((n + m - 1) // m) * m


def actor_kernel(x_ref, w1_ref, b1_ref, w2_ref, b2_ref, w3_ref, b3_ref, out_ref):
    """Fused Linear->ReLU->Linear->ReLU->Linear->tanh for one batch tile."""
    x = x_ref[...]

    # Layer 1: Linear + ReLU  (f32 accumulate on the MXU, bias rides the VPU).
    h1 = jnp.dot(x, w1_ref[...], preferred_element_type=jnp.float32) + b1_ref[...]
    h1 = jnp.maximum(h1, 0.0)

    # Layer 2: Linear + ReLU.
    h2 = jnp.dot(h1.astype(w2_ref.dtype), w2_ref[...],
                 preferred_element_type=jnp.float32) + b2_ref[...]
    h2 = jnp.maximum(h2, 0.0)

    # Layer 3: Linear + tanh  (tanh goes to the EUP -> overlaps MXU/DMA work).
    o = jnp.dot(h2.astype(w3_ref.dtype), w3_ref[...],
                preferred_element_type=jnp.float32) + b3_ref[...]
    out_ref[...] = jnp.tanh(o).astype(out_ref.dtype)


def prepare_actor_params(params, compute_dtype=None, hidden_pad: int = 128):
    """Pad/cast parameters ONCE (at init or whenever params update).

    Only the hidden dimension is padded to a multiple of `hidden_pad` so the
    hidden-layer matmuls see lane-aligned MXU tiles (use 256 on v6e/v7x if the
    network ever becomes compute bound).  Zero padding is mathematically inert
    (zero rows/cols stay zero through matmul/ReLU).  state_dim / action_dim
    stay unpadded so x and the output stream at their true width.  Biases stay
    f32 (they are added onto the f32 accumulator).
    """
    w1 = jnp.asarray(params["w1"])
    w2 = jnp.asarray(params["w2"])
    w3 = jnp.asarray(params["w3"])
    state_dim, hidden_dim = w1.shape
    action_dim = w3.shape[1]
    cdt = jnp.dtype(compute_dtype) if compute_dtype is not None else w1.dtype
    ph = _round_up(hidden_dim, hidden_pad)

    w1p = jnp.zeros((state_dim, ph), cdt).at[:, :hidden_dim].set(w1.astype(cdt))
    w2p = jnp.zeros((ph, ph), cdt).at[:hidden_dim, :hidden_dim].set(w2.astype(cdt))
    w3p = jnp.zeros((ph, action_dim), cdt).at[:hidden_dim, :].set(w3.astype(cdt))
    b1p = jnp.zeros((1, ph), jnp.float32).at[:, :hidden_dim].set(
        jnp.asarray(params["b1"]).reshape(1, -1).astype(jnp.float32))
    b2p = jnp.zeros((1, ph), jnp.float32).at[:, :hidden_dim].set(
        jnp.asarray(params["b2"]).reshape(1, -1).astype(jnp.float32))
    b3p = jnp.asarray(params["b3"]).reshape(1, -1).astype(jnp.float32)

    return {"w1": w1p, "b1": b1p, "w2": w2p, "b2": b2p, "w3": w3p, "b3": b3p}


@functools.partial(jax.jit, static_argnames=("block_batch",))
def actor_forward(x, prepared, *, block_batch: int = 1024):
    """x: [batch, state_dim]; prepared: output of prepare_actor_params."""
    batch, state_dim = x.shape
    w1, b1 = prepared["w1"], prepared["b1"]
    w2, b2 = prepared["w2"], prepared["b2"]
    w3, b3 = prepared["w3"], prepared["b3"]
    ph = w1.shape[1]
    action_dim = w3.shape[1]
    cdt = w1.dtype
    out_dtype = x.dtype
    xc = x.astype(cdt)  # no-op for the f32 path

    # Batch tiling: no padding of x / output.  Pallas masks the partial last
    # block; rows are independent so stale rows in that block are harmless.
    # Force >= 2 tiles for large batches so the "parallel" grid axis can use
    # both TensorCores on v7x.
    n_tiles = pl.cdiv(batch, block_batch)
    if batch >= 1024:
        n_tiles = max(n_tiles, 2)
    if n_tiles == 1:
        tb = batch                                   # block == full dim (always legal)
    else:
        tb = _round_up(pl.cdiv(batch, n_tiles), 8)   # sublane-aligned tile
    grid = (pl.cdiv(batch, tb),)

    # Weights / biases are VMEM-resident: constant index_map -> fetched once.
    resident = lambda shape: pl.BlockSpec(shape, lambda i: (0, 0))
    in_specs = [
        pl.BlockSpec((tb, state_dim), lambda i: (i, 0)),   # x streams per tile
        resident(w1.shape), resident(b1.shape),
        resident(w2.shape), resident(b2.shape),
        resident(w3.shape), resident(b3.shape),
    ]
    out_specs = pl.BlockSpec((tb, action_dim), lambda i: (i, 0))

    # VMEM budget: streamed x/out (double-buffered) + resident operands
    # (default double-buffer) + f32 intermediates + headroom; clamp to 48 MiB
    # (below v7x's 64 MiB physical VMEM, comfortable on v5e/v6e).
    isz = cdt.itemsize
    osz = jnp.dtype(out_dtype).itemsize
    weight_bytes = (state_dim * ph + ph * ph + ph * action_dim) * isz
    bias_bytes = (2 * ph + action_dim) * 4
    vmem_bytes = (
        2 * tb * state_dim * isz
        + 2 * tb * action_dim * osz
        + 2 * (weight_bytes + bias_bytes)
        + 2 * tb * ph * 4
        + (4 << 20)
    )
    vmem_bytes = int(min(max(vmem_bytes, 16 << 20), 48 << 20))

    cost = pl.CostEstimate(
        flops=2 * batch * (state_dim * ph + ph * ph + ph * action_dim),
        transcendentals=batch * action_dim,
        bytes_accessed=int(xc.nbytes + w1.nbytes + w2.nbytes + w3.nbytes
                           + b1.nbytes + b2.nbytes + b3.nbytes
                           + batch * action_dim * osz),
    )

    return pl.pallas_call(
        actor_kernel,
        out_shape=jax.ShapeDtypeStruct((batch, action_dim), out_dtype),
        grid=grid,
        in_specs=in_specs,
        out_specs=out_specs,
        compiler_params=pltpu.CompilerParams(
            dimension_semantics=("parallel",),
            vmem_limit_bytes=vmem_bytes,
        ),
        cost_estimate=cost,
    )(xc, w1, b1, w2, b2, w3, b3)


def init_actor_params(key, state_dim, hidden_dim, action_dim):
    """Deterministic init mimicking PyTorch nn.Linear's U(-1/sqrt(fan_in), ...)."""
    keys = jax.random.split(key, 6)

    def linear(kw, kb, fan_in, fan_out):
        bound = 1.0 / jnp.sqrt(jnp.float32(fan_in))
        w = jax.random.uniform(kw, (fan_in, fan_out), jnp.float32, -bound, bound)
        b = jax.random.uniform(kb, (1, fan_out), jnp.float32, -bound, bound)
        return w, b

    w1, b1 = linear(keys[0], keys[1], state_dim, hidden_dim)
    w2, b2 = linear(keys[2], keys[3], hidden_dim, hidden_dim)
    w3, b3 = linear(keys[4], keys[5], hidden_dim, action_dim)
    return {"w1": w1, "b1": b1, "w2": w2, "b2": b2, "w3": w3, "b3": b3}


def actor_forward_ref(x, p):
    h1 = jnp.maximum(x @ p["w1"] + p["b1"], 0.0)
    h2 = jnp.maximum(h1 @ p["w2"] + p["b2"], 0.0)
    return jnp.tanh(h2 @ p["w3"] + p["b3"])


if __name__ == "__main__":
    batch, state_dim, hidden_dim, action_dim = 2, 8, 32, 4

    key = jax.random.PRNGKey(0)
    k_x, k_p = jax.random.split(key)
    x = jax.random.normal(k_x, (batch, state_dim), jnp.float32)
    params = init_actor_params(k_p, state_dim, hidden_dim, action_dim)

    # Pad/cast the parameters ONCE (cached outside the per-step forward path).
    prepared_f32 = prepare_actor_params(params)

    out = jax.block_until_ready(actor_forward(x, prepared_f32))
    ref = jax.block_until_ready(actor_forward_ref(x, params))
    assert out.shape == (batch, action_dim)
    assert jnp.allclose(out, ref, atol=1e-5, rtol=1e-5)

    # Larger batch: multi-tile grid with an unpadded, partial last block.
    xb = jax.random.normal(k_x, (1037, state_dim), jnp.float32)
    out_b = jax.block_until_ready(actor_forward(xb, prepared_f32))
    ref_b = jax.block_until_ready(actor_forward_ref(xb, params))
    assert out_b.shape == (1037, action_dim)
    assert jnp.allclose(out_b, ref_b, atol=1e-5, rtol=1e-5)

    # bf16 compute path (recommended default on v6e/v7x) vs f32 reference.
    prepared_bf16 = prepare_actor_params(params, compute_dtype=jnp.bfloat16)
    out_bf = jax.block_until_ready(actor_forward(x, prepared_bf16))
    assert out_bf.shape == (batch, action_dim)
    assert jnp.allclose(out_bf, ref, atol=5e-2, rtol=5e-2)

    print("KERNEL_OK")
</pallas_src>

<mosaic_0001>
module attributes {stable_mosaic.version = 11 : i64} {
  func.func @actor_kernel(%arg0: i32, %arg1: memref<2x8xf32, #tpu.memory_space<vmem>>, %arg2: memref<8x128xf32, #tpu.memory_space<vmem>>, %arg3: memref<1x128xf32, #tpu.memory_space<vmem>>, %arg4: memref<128x128xf32, #tpu.memory_space<vmem>>, %arg5: memref<1x128xf32, #tpu.memory_space<vmem>>, %arg6: memref<128x4xf32, #tpu.memory_space<vmem>>, %arg7: memref<1x4xf32, #tpu.memory_space<vmem>>, %arg8: memref<2x4xf32, #tpu.memory_space<vmem>>) attributes {dimension_semantics = [#tpu.dimension_semantics<parallel>], iteration_bounds = array<i64: 1>, scalar_prefetch = 0 : i64, scratch_operands = 0 : i64, tpu.core_type = #tpu.core_type<tc>, window_params = [{transform_indices = @transform_0, window_bounds = array<i64: 2, 8>}, {pipeline_mode = #tpu.pipeline_mode<synchronous>, transform_indices = @transform_1, window_bounds = array<i64: 8, 128>}, {pipeline_mode = #tpu.pipeline_mode<synchronous>, transform_indices = @transform_2, window_bounds = array<i64: 1, 128>}, {pipeline_mode = #tpu.pipeline_mode<synchronous>, transform_indices = @transform_3, window_bounds = array<i64: 128, 128>}, {pipeline_mode = #tpu.pipeline_mode<synchronous>, transform_indices = @transform_4, window_bounds = array<i64: 1, 128>}, {pipeline_mode = #tpu.pipeline_mode<synchronous>, transform_indices = @transform_5, window_bounds = array<i64: 128, 4>}, {pipeline_mode = #tpu.pipeline_mode<synchronous>, transform_indices = @transform_6, window_bounds = array<i64: 1, 4>}, {transform_indices = @transform_7, window_bounds = array<i64: 2, 4>}]} {
    %c0 = arith.constant 0 : index
    %c0_0 = arith.constant 0 : index
    %0 = vector.load %arg1[%c0, %c0_0] : memref<2x8xf32, #tpu.memory_space<vmem>>, vector<2x8xf32>
    %c0_1 = arith.constant 0 : index
    %c0_2 = arith.constant 0 : index
    %1 = vector.load %arg2[%c0_1, %c0_2] : memref<8x128xf32, #tpu.memory_space<vmem>>, vector<8x128xf32>
    %cst = arith.constant dense<0.000000e+00> : vector<2x128xf32>
    %2 = tpu.matmul %0, %1, %cst {dimension_numbers = #tpu.dot_dimension_numbers<[1], [0], [0], [1], [0, 0, 1, 1], [], []>} : vector<2x8xf32>, vector<8x128xf32>, vector<2x128xf32> -> vector<2x128xf32>
    %c0_3 = arith.constant 0 : index
    %c0_4 = arith.constant 0 : index
    %3 = vector.load %arg3[%c0_3, %c0_4] : memref<1x128xf32, #tpu.memory_space<vmem>>, vector<1x128xf32>
    %4 = vector.broadcast %3 : vector<1x128xf32> to vector<2x128xf32>
    %5 = arith.addf %2, %4 : vector<2x128xf32>
    %cst_5 = arith.constant 0.000000e+00 : f32
    %6 = vector.broadcast %cst_5 : f32 to vector<2x128xf32>
    %7 = arith.maximumf %5, %6 : vector<2x128xf32>
    %c0_6 = arith.constant 0 : index
    %c0_7 = arith.constant 0 : index
    %8 = vector.load %arg4[%c0_6, %c0_7] : memref<128x128xf32, #tpu.memory_space<vmem>>, vector<128x128xf32>
    %cst_8 = arith.constant dense<0.000000e+00> : vector<2x128xf32>
    %9 = tpu.matmul %7, %8, %cst_8 {dimension_numbers = #tpu.dot_dimension_numbers<[1], [0], [0], [1], [0, 0, 1, 1], [], []>} : vector<2x128xf32>, vector<128x128xf32>, vector<2x128xf32> -> vector<2x128xf32>
    %c0_9 = arith.constant 0 : index
    %c0_10 = arith.constant 0 : index
    %10 = vector.load %arg5[%c0_9, %c0_10] : memref<1x128xf32, #tpu.memory_space<vmem>>, vector<1x128xf32>
    %11 = vector.broadcast %10 : vector<1x128xf32> to vector<2x128xf32>
    %12 = arith.addf %9, %11 : vector<2x128xf32>
    %cst_11 = arith.constant 0.000000e+00 : f32
    %13 = vector.broadcast %cst_11 : f32 to vector<2x128xf32>
    %14 = arith.maximumf %12, %13 : vector<2x128xf32>
    %c0_12 = arith.constant 0 : index
    %c0_13 = arith.constant 0 : index
    %15 = vector.load %arg6[%c0_12, %c0_13] : memref<128x4xf32, #tpu.memory_space<vmem>>, vector<128x4xf32>
    %cst_14 = arith.constant dense<0.000000e+00> : vector<2x4xf32>
    %16 = tpu.matmul %14, %15, %cst_14 {dimension_numbers = #tpu.dot_dimension_numbers<[1], [0], [0], [1], [0, 0, 1, 1], [], []>} : vector<2x128xf32>, vector<128x4xf32>, vector<2x4xf32> -> vector<2x4xf32>
    %c0_15 = arith.constant 0 : index
    %c0_16 = arith.constant 0 : index
    %17 = vector.load %arg7[%c0_15, %c0_16] : memref<1x4xf32, #tpu.memory_space<vmem>>, vector<1x4xf32>
    %18 = vector.broadcast %17 : vector<1x4xf32> to vector<2x4xf32>
    %19 = arith.addf %16, %18 : vector<2x4xf32>
    %20 = math.tanh %19 : vector<2x4xf32>
    %c0_17 = arith.constant 0 : index
    %c0_18 = arith.constant 0 : index
    %21 = vector.load %arg8[%c0_17, %c0_18] : memref<2x4xf32, #tpu.memory_space<vmem>>, vector<2x4xf32>
    tpu.vector_store %arg8[%c0_17, %c0_18], %20 {strides = array<i32>} : memref<2x4xf32, #tpu.memory_space<vmem>>, vector<2x4xf32>,
    return
  }
  func.func @transform_0(%arg0: i32) -> (i32, i32) {
    %c0_i32 = arith.constant 0 : i32
    %c0_i32_0 = arith.constant 0 : i32
    return %arg0, %c0_i32 : i32, i32
  }
  func.func @transform_1(%arg0: i32) -> (i32, i32) {
    %c0_i32 = arith.constant 0 : i32
    %c0_i32_0 = arith.constant 0 : i32
    %c0_i32_1 = arith.constant 0 : i32
    return %c0_i32, %c0_i32_0 : i32, i32
  }
  func.func @transform_2(%arg0: i32) -> (i32, i32) {
    %c0_i32 = arith.constant 0 : i32
    %c0_i32_0 = arith.constant 0 : i32
    %c0_i32_1 = arith.constant 0 : i32
    return %c0_i32, %c0_i32_0 : i32, i32
  }
  func.func @transform_3(%arg0: i32) -> (i32, i32) {
    %c0_i32 = arith.constant 0 : i32
    %c0_i32_0 = arith.constant 0 : i32
    %c0_i32_1 = arith.constant 0 : i32
    return %c0_i32, %c0_i32_0 : i32, i32
  }
  func.func @transform_4(%arg0: i32) -> (i32, i32) {
    %c0_i32 = arith.constant 0 : i32
    %c0_i32_0 = arith.constant 0 : i32
    %c0_i32_1 = arith.constant 0 : i32
    return %c0_i32, %c0_i32_0 : i32, i32
  }
  func.func @transform_5(%arg0: i32) -> (i32, i32) {
    %c0_i32 = arith.constant 0 : i32
    %c0_i32_0 = arith.constant 0 : i32
    %c0_i32_1 = arith.constant 0 : i32
    return %c0_i32, %c0_i32_0 : i32, i32
  }
  func.func @transform_6(%arg0: i32) -> (i32, i32) {
    %c0_i32 = arith.constant 0 : i32
    %c0_i32_0 = arith.constant 0 : i32
    %c0_i32_1 = arith.constant 0 : i32
    return %c0_i32, %c0_i32_0 : i32, i32
  }
  func.func @transform_7(%arg0: i32) -> (i32, i32) {
    %c0_i32 = arith.constant 0 : i32
    %c0_i32_0 = arith.constant 0 : i32
    return %arg0, %c0_i32 : i32, i32
  }
}

</mosaic_0001>

<bundles_post_ra>
// kernel: actor_forward.1
= control target key start
LH: loop header
LB: loop body
LE: loop exit
PB: predicated region body
PF: predicated region fallthrough
CT: control target
= control target key end

     0   :  { %12 = vsyncpa [#allocation3], 0  ;;  %s514_s0 = inlined_call_operand.hbm [shape: f32[2,8], index: 0, kind: input, shape index: {}]   ;;  %s515_s1 = inlined_call_operand.vmem [shape: f32[8,128], index: 1, kind: input, shape index: {}]   ;;  %s516_s2 = inlined_call_operand.hbm [shape: f32[1,128], index: 2, kind: input, shape index: {}]   ;;  %s517_s3 = inlined_call_operand.vmem [shape: f32[128,128], index: 3, kind: input, shape index: {}]   ;;  %s518_s4 = inlined_call_operand.hbm [shape: f32[1,128], index: 4, kind: input, shape index: {}]   ;;  %s519_s5 = inlined_call_operand.vmem [shape: f32[128,4], index: 5, kind: input, shape index: {}]   ;;  %s520_s6 = inlined_call_operand.hbm [shape: f32[1,4], index: 6, kind: input, shape index: {}]   ;;  %s521_s7 = inlined_call_operand.hbm [shape: f32[2,4], index: 7, kind: output, shape index: {}]  }
   0x1   :  { %13 = vsyncpa [#allocation6], 0 }
   0x2   :  { %14 = vsyncpa [#allocation9], 0  ;;  %s34_s26 = sshll.u32 %s516_s2, 4  ;;  %s35_s26 = int_to_ptr.hbm [resolvable:$true] %s34_s26 }
   0x3   :  { %15 = vsyncpa [#allocation4], 0  ;;  %s355_s27 = smov [#allocation5]   ;;  %s21_s8 = sshll.u32 %s514_s0, 4  ;;  %s22_s8 = int_to_ptr.hbm [resolvable:$true] %s21_s8 }
   0x4   :  { %s36_s28 = sshll.u32 %s355_s27, 4  ;;  %s356_s9 = smov [#allocation2]   ;;  %s37_s28 = int_to_ptr.vmem [resolvable:$true] %s36_s28 }
   0x5   :  { %39 = dma.hbm_to_vmem [thread:$0]  %s35_s26, 16, %s37_s28, [#allocation6]  }
   0x6   :  { %s23_s10 = sshll.u32 %s356_s9, 4  ;;  %s47_s13 = sshll.u32 %s518_s4, 4  ;;  %s24_s10 = int_to_ptr.vmem [resolvable:$true] %s23_s10  ;;  %s48_s13 = int_to_ptr.hbm [resolvable:$true] %s47_s13 }
   0x7   :  { %26 = dma.hbm_to_vmem [thread:$0]  %s22_s8, 32, %s24_s10, [#allocation3]  }
   0x8   :  { %s60_s15 = sshll.u32 %s520_s6, 4  ;;  %s357_s16 = smov [#allocation7]   ;;  %s61_s15 = int_to_ptr.hbm [resolvable:$true] %s60_s15 }
   0x9   :  { %s49_s17 = sshll.u32 %s357_s16, 4  ;;  %s358_s0 = smov [#allocation8]   ;;  %s50_s17 = int_to_ptr.vmem [resolvable:$true] %s49_s17 }
   0xa   :  { %52 = dma.hbm_to_vmem [thread:$0]  %s48_s13, 16, %s50_s17, [#allocation6]  }
   0xb   :  { %s62_s18 = sshll.u32 %s358_s0, 4  ;;  %s63_s18 = int_to_ptr.vmem [resolvable:$true] %s62_s18 }
   0xc   :  { %65 = dma.hbm_to_vmem [thread:$0]  %s61_s15, 16, %s63_s18, [#allocation9]  }
   0xd   :  { %347 = dma.done.wait [#allocation3], 32  }
   0xe   :  { %348 = vsyncadd [#allocation3], 4294967264 }
   0xf   :  { %349 = dma.done.wait [#allocation6], 32  }
  0x10   :  { %350 = vsyncadd [#allocation6], 4294967264 }
  0x11   :  { %351 = dma.done.wait [#allocation9], 16  }
  0x12   :  { %352 = vsyncadd [#allocation9], 4294967280  ;;  %vm88_vm0 = vcmask 64512   ;;  %v83_v0 = vld [vmem:[%s515_s1] sm:$0xff]  ;;  %v128_v2 = vld [vmem:[%s517_s3 + $0x78] sm:$0xff]  ;;  %s359_s26 = smov [#allocation10]  }
  0x13   :  { %v82_v1 = vld [vmem:[#allocation2] sm:$0x3]  ;;  %107 = vmatpush.msra.mxu0 %v83_v0  ;;  %133 = vmatpush.msra.mxu1 %v128_v2  ;;  %v127_v3 = vld [vmem:[%s517_s3 + $0x70] sm:$0xff]  ;;  %v126_v4 = vld [vmem:[%s517_s3 + $0x68] sm:$0xff]  ;;  %s202_s1 = sshll.u32 %s359_s26, 4  ;;  %s204_s29 = sshll.u32 %s521_s7, 4  ;;  %s203_s1 = int_to_ptr.vmem [resolvable:$true] %s202_s1  ;;  %s205_s29 = int_to_ptr.hbm [resolvable:$true] %s204_s29 }
  0x14   :  { %216 = vmatmul.msk.f32.vlgmr.msra.gmra.mxu0 %vm88_vm0, %v82_v1  ;;  %v125_v5 = vld [vmem:[%s517_s3 + $0x60] sm:$0xff]  ;;  %v124_v6 = vld [vmem:[%s517_s3 + $0x58] sm:$0xff]  ;;  %v123_v7 = vld [vmem:[%s517_s3 + $0x50] sm:$0xff]  ;;  %vm195_vm1 = vcmask 25600  }
  0x15   :  { %134 = vmatpush.msra.mxu1 %v127_v3  ;;  %v122_v8 = vld [vmem:[%s517_s3 + $0x48] sm:$0xff]  ;;  %v121_v9 = vld [vmem:[%s517_s3 + $0x40] sm:$0xff]  ;;  %v120_v10 = vld [vmem:[%s517_s3 + $0x38] sm:$0xff] }
  0x16   :  { %v119_v11 = vld [vmem:[%s517_s3 + $0x30] sm:$0xff]  ;;  %v118_v12 = vld [vmem:[%s517_s3 + $0x28] sm:$0xff]  ;;  %v117_v13 = vld [vmem:[%s517_s3 + $0x20] sm:$0xff] }
  0x17   :  { %135 = vmatpush.msra.mxu1 %v126_v4  ;;  %v116_v14 = vld [vmem:[%s517_s3 + $0x18] sm:$0xff]  ;;  %v115_v15 = vld [vmem:[%s517_s3 + $0x10] sm:$0xff]  ;;  %v114_v16 = vld [vmem:[%s517_s3 + $0x8] sm:$0xff] }
  0x18   :  { %v113_v17 = vld [vmem:[%s517_s3] sm:$0xff]  ;;  %v169_v18 = vld [vmem:[%s519_s5 + $0x78] sm:$0xff]  ;;  %v168_v19 = vld [vmem:[%s519_s5 + $0x70] sm:$0xff] }
  0x19   :  { %136 = vmatpush.msra.mxu1 %v125_v5  ;;  %174 = vmatpush.msra.mxu2 %v169_v18  ;;  %v167_v20 = vld [vmem:[%s519_s5 + $0x68] sm:$0xff]  ;;  %v166_v21 = vld [vmem:[%s519_s5 + $0x60] sm:$0xff]  ;;  %v165_v22 = vld [vmem:[%s519_s5 + $0x58] sm:$0xff] }
  0x1a   :  { %v164_v23 = vld [vmem:[%s519_s5 + $0x50] sm:$0xff]  ;;  %v163_v24 = vld [vmem:[%s519_s5 + $0x48] sm:$0xff]  ;;  %v162_v25 = vld [vmem:[%s519_s5 + $0x40] sm:$0xff] }
  0x1b   :  { %137 = vmatpush.msra.mxu1 %v124_v6  ;;  %175 = vmatpush.msra.mxu2 %v168_v19  ;;  %v161_v26 = vld [vmem:[%s519_s5 + $0x38] sm:$0xff]  ;;  %v160_v27 = vld [vmem:[%s519_s5 + $0x30] sm:$0xff]  ;;  %v159_v28 = vld [vmem:[%s519_s5 + $0x28] sm:$0xff] }
  0x1c   :  { %v158_v29 = vld [vmem:[%s519_s5 + $0x20] sm:$0xff]  ;;  %v157_v30 = vld [vmem:[%s519_s5 + $0x18] sm:$0xff]  ;;  %v156_v35 = vld [vmem:[%s519_s5 + $0x10] sm:$0xff] }
  0x1d   :  { %138 = vmatpush.msra.mxu1 %v123_v7  ;;  %176 = vmatpush.msra.mxu2 %v167_v20  ;;  %v222_v31 = vld [vmem:[#allocation5] ss:$0 sm:$0xff]  ;;  %v155_v36 = vld [vmem:[%s519_s5 + $0x8] sm:$0xff]  ;;  %v223_v38 = vld [vmem:[#allocation7] ss:$0 sm:$0xff] }
  0x1e   :  { %v154_v37 = vld [vmem:[%s519_s5] sm:$0xff] }
  0x1f   :  { %139 = vmatpush.msra.mxu1 %v122_v8  ;;  %177 = vmatpush.msra.mxu2 %v166_v21  ;;  %v224_v42 = vld [vmem:[#allocation8] ss:$0 sm:$0xff] }
  0x21   :  { %140 = vmatpush.msra.mxu1 %v121_v9  ;;  %178 = vmatpush.msra.mxu2 %v165_v22 }
  0x23   :  { %141 = vmatpush.msra.mxu1 %v120_v10  ;;  %179 = vmatpush.msra.mxu2 %v164_v23 }
  0x25   :  { %142 = vmatpush.msra.mxu1 %v119_v11  ;;  %180 = vmatpush.msra.mxu2 %v163_v24 }
  0x27   :  { %143 = vmatpush.msra.mxu1 %v118_v12  ;;  %181 = vmatpush.msra.mxu2 %v162_v25 }
  0x29   :  { %144 = vmatpush.msra.mxu1 %v117_v13  ;;  %182 = vmatpush.msra.mxu2 %v161_v26 }
  0x2b   :  { %145 = vmatpush.msra.mxu1 %v116_v14  ;;  %183 = vmatpush.msra.mxu2 %v160_v27 }
  0x2d   :  { %146 = vmatpush.msra.mxu1 %v115_v15  ;;  %184 = vmatpush.msra.mxu2 %v159_v28 }
  0x2f   :  { %147 = vmatpush.msra.mxu1 %v114_v16  ;;  %185 = vmatpush.msra.mxu2 %v158_v29 }
  0x31   :  { %148 = vmatpush.msra.mxu1 %v113_v17  ;;  %186 = vmatpush.msra.mxu2 %v157_v30 }
  0x33   :  { %187 = vmatpush.msra.mxu2 %v156_v35 }
  0x35   :  { %188 = vmatpush.msra.mxu2 %v155_v36 }
  0x37   :  { %189 = vmatpush.msra.mxu2 %v154_v37 }
  0x91   :  { %v109_v32 = vpop.f32.mrf.mxu0 }
  0x92   :  { %v110_v33 = vadd.f32 %v222_v31, %v109_v32 }
  0x94   :  { %v112_v34 = vmax.f32 %v110_v33, 0.0 }
  0x96   :  { %149 = vmatmul.f32.vlgmr.msra.gmra.mxu1 %v112_v34 }
 0x113   :  { %v150_v39 = vpop.f32.mrf.mxu1 }
 0x114   :  { %v151_v40 = vadd.f32 %v223_v38, %v150_v39 }
 0x116   :  { %v153_v41 = vmax.f32 %v151_v40, 0.0 }
 0x118   :  { %190 = vmatmul.f32.vlgmr.msra.gmra.mxu2 %v153_v41 }
 0x19b   :  { %v191_v43 = vpop.f32.mrf.mxu2 }
 0x19c   :  { %v192_v44 = vadd.f32 %v224_v42, %v191_v43 }
 0x19e   :  { %225 = vtanh.f32 %v192_v44 }
 0x1a4   :  { %v226_v45 = vpop.eup %225 }
 0x1a5   :  { %196 = vst.msk [vmem:[#allocation10] sm:$0x3] %vm195_vm1, %v226_v45 }
 0x1a6   :  { %207 = dma.vmem_to_hbm [thread:$0]  %s203_s1, 32, %s205_s29, [#allocation4]  }
 0x1a7   :  { %353 = dma.done.wait [#allocation4], 32  }
 0x1a8   :  { %354 = vsyncadd [#allocation4], 4294967264 }
 0x1a9   :  { %212 = vsyncpa [#allocation3], 1 }
 0x1aa   :  { %213 = vsyncpa [#allocation6], 1 }
 0x1ab   :  { %214 = vsyncpa [#allocation9], 1 }
 0x1ac   :  { %215 = vsyncpa [#allocation4], 1 }

</bundles_post_ra>
